<compile_context>
chip_gen: v5e
topology: v5e:2x2
jax: 0.10.0
libtpu: 0.0.40
codegen_flags: <defaults>
</compile_context>

<pallas_src>
import jax
import jax.numpy as jnp
from jax.experimental import pallas as pl
from jax.experimental.pallas import tpu as pltpu


def mlp_kernel_single(x_ref, wfc_ref, bfc_ref, wproj_ref, bproj_ref, o_ref):
    """Whole hidden dim in one chunk: y = gelu_tanh(x @ Wfc + bfc) @ Wproj + bproj."""
    h = jnp.dot(x_ref[...], wfc_ref[...], preferred_element_type=jnp.float32)
    h = h + bfc_ref[...].astype(jnp.float32)
    h = jax.nn.gelu(h, approximate=True)          # tanh approximation
    y = jnp.dot(h.astype(wproj_ref.dtype), wproj_ref[...],
                preferred_element_type=jnp.float32)
    o_ref[...] = (y + bproj_ref[...].astype(jnp.float32)).astype(o_ref.dtype)


def mlp_kernel_tiled(x_ref, wfc_ref, bfc_ref, wproj_ref, bproj_ref, o_ref,
                     acc_ref):
    """One (tm x th) hidden chunk. Grid: (M/tm, H/th); axis 1 is the reduction."""
    k = pl.program_id(1)

    @pl.when(k == 0)
    def _():
        acc_ref[...] = jnp.zeros_like(acc_ref)

    # c_fc chunk: (tm, E) @ (E, th) -> (tm, th), f32 accumulation on the MXU.
    h = jnp.dot(x_ref[...], wfc_ref[...], preferred_element_type=jnp.float32)
    h = h + bfc_ref[...].astype(jnp.float32)

    # GELU (tanh approximation, matches nn.GELU(approximate='tanh')) in f32.
    h = jax.nn.gelu(h, approximate=True)

    # c_proj chunk: (tm, th) @ (th, E) -> (tm, E); cast back to weight dtype
    # (bf16 MXU path) and accumulate in f32.
    acc_ref[...] += jnp.dot(h.astype(wproj_ref.dtype), wproj_ref[...],
                            preferred_element_type=jnp.float32)

    @pl.when(k == pl.num_programs(1) - 1)
    def _():
        o_ref[...] = (acc_ref[...]
                      + bproj_ref[...].astype(jnp.float32)).astype(o_ref.dtype)


def _round_up(a, b):
    return (a + b - 1) // b * b


def _pick_th(H, th_target):
    """Largest multiple of 128 that divides H and is <= th_target (else H)."""
    c = (min(th_target, H) // 128) * 128
    while c >= 128:
        if H % c == 0:
            return c
        c -= 128
    return H


def _vmem_budget(tm, th, E, H, wbytes, xbytes):
    """Approximate double-buffered VMEM footprint (bytes)."""
    del H
    return (2 * (E * th + th * E) * wbytes   # Wfc / Wproj chunks (double-buffered)
            + 2 * (th + E) * wbytes          # bias chunks
            + 2 * tm * E * xbytes            # x tile
            + 2 * tm * E * xbytes            # out tile
            + tm * E * 4                     # f32 accumulator scratch
            + 2 * tm * th * 4)               # f32 intermediates (h / gelu temp)


_VMEM_TARGET = 56 << 20  # leave headroom on v7x's 64 MiB per-TC VMEM


def mlp_pallas(x, w_fc, b_fc, w_proj, b_proj, *, tm=256, th=512):
    """x: (B, T, E). w_fc: (E, 4E), b_fc: (4E,), w_proj: (4E, E), b_proj: (E,)."""
    B, T, E = x.shape
    H = w_fc.shape[1]
    M = B * T

    wbytes = jnp.dtype(w_fc.dtype).itemsize
    xbytes = jnp.dtype(x.dtype).itemsize

    # Row tile: clamp to the (16-aligned) problem size.
    tm_eff = min(tm, _round_up(M, 16))
    # Hidden-dim tile: multiple of 128 that divides H (fall back to full H,
    # which keeps small/odd test configs legal).
    th_eff = _pick_th(H, th)

    # Auto-fit the double-buffered footprint to the VMEM target: shrink the
    # hidden chunk first (never the output-E / lane axis), then the row tile.
    while _vmem_budget(tm_eff, th_eff, E, H, wbytes, xbytes) > _VMEM_TARGET:
        if th_eff > 128 and th_eff != H:
            new_th = _pick_th(H, th_eff - 128)
            if new_th < th_eff:
                th_eff = new_th
                continue
        if tm_eff > 64:
            tm_eff = max(64, tm_eff // 2)
            continue
        break

    M_pad = _round_up(M, tm_eff)

    x2d = x.reshape(M, E)
    if M_pad != M:
        x2d = jnp.pad(x2d, ((0, M_pad - M), (0, 0)))
    b_fc2d = b_fc.reshape(1, H)
    b_proj2d = b_proj.reshape(1, E)

    budget = _vmem_budget(tm_eff, th_eff, E, H, wbytes, xbytes)
    vmem_limit = int(min(max(budget + budget // 2, 32 << 20), 64 << 20))

    n_row = M_pad // tm_eff
    n_hid = H // th_eff

    cost = pl.CostEstimate(
        flops=4 * M_pad * E * H,              # two matmuls: 2*M*E*H each
        transcendentals=M_pad * H,            # tanh in GELU
        bytes_accessed=(2 * M_pad * E * xbytes            # x + out
                        + n_row * 2 * E * H * wbytes),    # weights re-streamed / row tile
    )

    common = dict(
        out_shape=jax.ShapeDtypeStruct((M_pad, E), x.dtype),
        cost_estimate=cost,
    )

    if n_hid == 1:
        # Whole hidden dim resident: no accumulator, single pass per row tile.
        out2d = pl.pallas_call(
            mlp_kernel_single,
            grid_spec=pltpu.PrefetchScalarGridSpec(
                num_scalar_prefetch=0,
                grid=(n_row,),
                in_specs=[
                    pl.BlockSpec((tm_eff, E), lambda i: (i, 0)),   # x tile
                    pl.BlockSpec((E, H), lambda i: (0, 0)),        # Wfc
                    pl.BlockSpec((1, H), lambda i: (0, 0)),        # bfc
                    pl.BlockSpec((H, E), lambda i: (0, 0)),        # Wproj
                    pl.BlockSpec((1, E), lambda i: (0, 0)),        # bproj
                ],
                out_specs=pl.BlockSpec((tm_eff, E), lambda i: (i, 0)),
            ),
            compiler_params=pltpu.CompilerParams(
                dimension_semantics=("parallel",),
                vmem_limit_bytes=vmem_limit,
            ),
            **common,
        )(x2d, w_fc, b_fc2d, w_proj, b_proj2d)
    else:
        out2d = pl.pallas_call(
            mlp_kernel_tiled,
            grid_spec=pltpu.PrefetchScalarGridSpec(
                num_scalar_prefetch=0,
                grid=(n_row, n_hid),
                in_specs=[
                    pl.BlockSpec((tm_eff, E), lambda i, k: (i, 0)),    # x tile
                    pl.BlockSpec((E, th_eff), lambda i, k: (0, k)),    # Wfc chunk
                    pl.BlockSpec((1, th_eff), lambda i, k: (0, k)),    # bfc chunk
                    pl.BlockSpec((th_eff, E), lambda i, k: (k, 0)),    # Wproj chunk
                    pl.BlockSpec((1, E), lambda i, k: (0, 0)),         # bproj
                ],
                out_specs=pl.BlockSpec((tm_eff, E), lambda i, k: (i, 0)),
                scratch_shapes=[pltpu.VMEM((tm_eff, E), jnp.float32)],
            ),
            compiler_params=pltpu.CompilerParams(
                dimension_semantics=("parallel", "arbitrary"),
                vmem_limit_bytes=vmem_limit,
            ),
            **common,
        )(x2d, w_fc, b_fc2d, w_proj, b_proj2d)

    return out2d[:M].reshape(B, T, E)


def mlp_ref(x, w_fc, b_fc, w_proj, b_proj):
    h = jnp.dot(x, w_fc) + b_fc
    h = jax.nn.gelu(h, approximate=True)
    return jnp.dot(h, w_proj) + b_proj


if __name__ == "__main__":
    key = jax.random.PRNGKey(0)

    # --- small GPT-style config: batch=2, seq=8, n_embd=32 (hidden = 128) ---
    B, T, E = 2, 8, 32
    H = 4 * E
    kx, kw1, kb1, kw2, kb2, kx2 = jax.random.split(key, 6)

    x = jax.random.normal(kx, (B, T, E), dtype=jnp.float32)
    # torch nn.Linear weights are (out, in); stored pre-transposed here.
    w_fc = jax.random.normal(kw1, (E, H), dtype=jnp.float32) * 0.02
    b_fc = jax.random.normal(kb1, (H,), dtype=jnp.float32) * 0.02
    w_proj = jax.random.normal(kw2, (H, E), dtype=jnp.float32) * 0.02
    b_proj = jax.random.normal(kb2, (E,), dtype=jnp.float32) * 0.02

    # f32 path (single-chunk kernel): exact-precision check.
    out = mlp_pallas(x, w_fc, b_fc, w_proj, b_proj)
    out = jax.block_until_ready(out)
    ref = mlp_ref(x, w_fc, b_fc, w_proj, b_proj)
    assert out.shape == (B, T, E)
    assert jnp.allclose(out, ref, atol=1e-5, rtol=1e-5)

    # bf16 path on the same small config.
    xb = x.astype(jnp.bfloat16)
    wfb, bfb = w_fc.astype(jnp.bfloat16), b_fc.astype(jnp.bfloat16)
    wpb, bpb = w_proj.astype(jnp.bfloat16), b_proj.astype(jnp.bfloat16)
    out_bf16 = jax.block_until_ready(mlp_pallas(xb, wfb, bfb, wpb, bpb))
    ref_bf16 = mlp_ref(xb.astype(jnp.float32), wfb.astype(jnp.float32),
                       bfb.astype(jnp.float32), wpb.astype(jnp.float32),
                       bpb.astype(jnp.float32))
    assert jnp.allclose(out_bf16.astype(jnp.float32), ref_bf16,
                        atol=2e-2, rtol=2e-2)

    # --- medium config exercising the tiled / accumulator path (grid 2x2) ---
    B2, T2, E2 = 2, 128, 256
    H2 = 4 * E2
    kk = jax.random.split(kx2, 5)
    x2 = jax.random.normal(kk[0], (B2, T2, E2), dtype=jnp.bfloat16)
    w_fc2 = (jax.random.normal(kk[1], (E2, H2), dtype=jnp.float32) * 0.02
             ).astype(jnp.bfloat16)
    b_fc2 = (jax.random.normal(kk[2], (H2,), dtype=jnp.float32) * 0.02
             ).astype(jnp.bfloat16)
    w_proj2 = (jax.random.normal(kk[3], (H2, E2), dtype=jnp.float32) * 0.02
               ).astype(jnp.bfloat16)
    b_proj2 = (jax.random.normal(kk[4], (E2,), dtype=jnp.float32) * 0.02
               ).astype(jnp.bfloat16)

    out2 = mlp_pallas(x2, w_fc2, b_fc2, w_proj2, b_proj2, tm=128, th=512)
    out2 = jax.block_until_ready(out2)
    ref2 = mlp_ref(x2.astype(jnp.float32), w_fc2.astype(jnp.float32),
                   b_fc2.astype(jnp.float32), w_proj2.astype(jnp.float32),
                   b_proj2.astype(jnp.float32))
    assert out2.shape == (B2, T2, E2)
    assert jnp.allclose(out2.astype(jnp.float32), ref2, atol=2e-2, rtol=2e-2)

    print("KERNEL_OK")
</pallas_src>

<mosaic_0001>
module attributes {stable_mosaic.version = 11 : i64} {
  func.func @mlp_kernel_single(%arg0: i32, %arg1: memref<16x32xf32, #tpu.memory_space<vmem>>, %arg2: memref<32x128xf32, #tpu.memory_space<vmem>>, %arg3: memref<1x128xf32, #tpu.memory_space<vmem>>, %arg4: memref<128x32xf32, #tpu.memory_space<vmem>>, %arg5: memref<1x32xf32, #tpu.memory_space<vmem>>, %arg6: memref<16x32xf32, #tpu.memory_space<vmem>>) attributes {dimension_semantics = [#tpu.dimension_semantics<parallel>], iteration_bounds = array<i64: 1>, scalar_prefetch = 0 : i64, scratch_operands = 0 : i64, tpu.core_type = #tpu.core_type<tc>, window_params = [{transform_indices = @transform_0, window_bounds = array<i64: 16, 32>}, {pipeline_mode = #tpu.pipeline_mode<synchronous>, transform_indices = @transform_1, window_bounds = array<i64: 32, 128>}, {pipeline_mode = #tpu.pipeline_mode<synchronous>, transform_indices = @transform_2, window_bounds = array<i64: 1, 128>}, {pipeline_mode = #tpu.pipeline_mode<synchronous>, transform_indices = @transform_3, window_bounds = array<i64: 128, 32>}, {pipeline_mode = #tpu.pipeline_mode<synchronous>, transform_indices = @transform_4, window_bounds = array<i64: 1, 32>}, {transform_indices = @transform_5, window_bounds = array<i64: 16, 32>}]} {
    %c0 = arith.constant 0 : index
    %c0_0 = arith.constant 0 : index
    %0 = vector.load %arg1[%c0, %c0_0] : memref<16x32xf32, #tpu.memory_space<vmem>>, vector<16x32xf32>
    %c0_1 = arith.constant 0 : index
    %c0_2 = arith.constant 0 : index
    %1 = vector.load %arg2[%c0_1, %c0_2] : memref<32x128xf32, #tpu.memory_space<vmem>>, vector<32x128xf32>
    %cst = arith.constant dense<0.000000e+00> : vector<16x128xf32>
    %2 = tpu.matmul %0, %1, %cst {dimension_numbers = #tpu.dot_dimension_numbers<[1], [0], [0], [1], [0, 0, 1, 1], [], []>} : vector<16x32xf32>, vector<32x128xf32>, vector<16x128xf32> -> vector<16x128xf32>
    %c0_3 = arith.constant 0 : index
    %c0_4 = arith.constant 0 : index
    %3 = vector.load %arg3[%c0_3, %c0_4] : memref<1x128xf32, #tpu.memory_space<vmem>>, vector<1x128xf32>
    %4 = vector.broadcast %3 : vector<1x128xf32> to vector<16x128xf32>
    %5 = arith.addf %2, %4 : vector<16x128xf32>
    %6 = arith.mulf %5, %5 : vector<16x128xf32>
    %7 = arith.mulf %5, %6 : vector<16x128xf32>
    %cst_5 = arith.constant 4.471500e-02 : f32
    %8 = vector.broadcast %cst_5 : f32 to vector<16x128xf32>
    %9 = arith.mulf %8, %7 : vector<16x128xf32>
    %10 = arith.addf %5, %9 : vector<16x128xf32>
    %cst_6 = arith.constant 0.797884583 : f32
    %11 = vector.broadcast %cst_6 : f32 to vector<16x128xf32>
    %12 = arith.mulf %11, %10 : vector<16x128xf32>
    %13 = math.tanh %12 : vector<16x128xf32>
    %cst_7 = arith.constant 1.000000e+00 : f32
    %14 = vector.broadcast %cst_7 : f32 to vector<16x128xf32>
    %15 = arith.addf %14, %13 : vector<16x128xf32>
    %cst_8 = arith.constant 5.000000e-01 : f32
    %16 = vector.broadcast %cst_8 : f32 to vector<16x128xf32>
    %17 = arith.mulf %16, %15 : vector<16x128xf32>
    %18 = arith.mulf %5, %17 : vector<16x128xf32>
    %c0_9 = arith.constant 0 : index
    %c0_10 = arith.constant 0 : index
    %19 = vector.load %arg4[%c0_9, %c0_10] : memref<128x32xf32, #tpu.memory_space<vmem>>, vector<128x32xf32>
    %cst_11 = arith.constant dense<0.000000e+00> : vector<16x32xf32>
    %20 = tpu.matmul %18, %19, %cst_11 {dimension_numbers = #tpu.dot_dimension_numbers<[1], [0], [0], [1], [0, 0, 1, 1], [], []>} : vector<16x128xf32>, vector<128x32xf32>, vector<16x32xf32> -> vector<16x32xf32>
    %c0_12 = arith.constant 0 : index
    %c0_13 = arith.constant 0 : index
    %21 = vector.load %arg5[%c0_12, %c0_13] : memref<1x32xf32, #tpu.memory_space<vmem>>, vector<1x32xf32>
    %22 = vector.broadcast %21 : vector<1x32xf32> to vector<16x32xf32>
    %23 = arith.addf %20, %22 : vector<16x32xf32>
    %c0_14 = arith.constant 0 : index
    %c0_15 = arith.constant 0 : index
    %24 = vector.load %arg6[%c0_14, %c0_15] : memref<16x32xf32, #tpu.memory_space<vmem>>, vector<16x32xf32>
    tpu.vector_store %arg6[%c0_14, %c0_15], %23 {strides = array<i32>} : memref<16x32xf32, #tpu.memory_space<vmem>>, vector<16x32xf32>,
    return
  }
  func.func @transform_0(%arg0: i32) -> (i32, i32) {
    %c0_i32 = arith.constant 0 : i32
    %c0_i32_0 = arith.constant 0 : i32
    return %arg0, %c0_i32 : i32, i32
  }
  func.func @transform_1(%arg0: i32) -> (i32, i32) {
    %c0_i32 = arith.constant 0 : i32
    %c0_i32_0 = arith.constant 0 : i32
    %c0_i32_1 = arith.constant 0 : i32
    return %c0_i32, %c0_i32_0 : i32, i32
  }
  func.func @transform_2(%arg0: i32) -> (i32, i32) {
    %c0_i32 = arith.constant 0 : i32
    %c0_i32_0 = arith.constant 0 : i32
    %c0_i32_1 = arith.constant 0 : i32
    return %c0_i32, %c0_i32_0 : i32, i32
  }
  func.func @transform_3(%arg0: i32) -> (i32, i32) {
    %c0_i32 = arith.constant 0 : i32
    %c0_i32_0 = arith.constant 0 : i32
    %c0_i32_1 = arith.constant 0 : i32
    return %c0_i32, %c0_i32_0 : i32, i32
  }
  func.func @transform_4(%arg0: i32) -> (i32, i32) {
    %c0_i32 = arith.constant 0 : i32
    %c0_i32_0 = arith.constant 0 : i32
    %c0_i32_1 = arith.constant 0 : i32
    return %c0_i32, %c0_i32_0 : i32, i32
  }
  func.func @transform_5(%arg0: i32) -> (i32, i32) {
    %c0_i32 = arith.constant 0 : i32
    %c0_i32_0 = arith.constant 0 : i32
    return %arg0, %c0_i32 : i32, i32
  }
}

</mosaic_0001>

<bundles_post_ra>
// kernel: tpu_custom_call.1
= control target key start
LH: loop header
LB: loop body
LE: loop exit
PB: predicated region body
PF: predicated region fallthrough
CT: control target
= control target key end

     0   :  { %s307_s0 = inlined_call_operand.vmem [shape: f32[16,32], index: 0, kind: input, shape index: {}]   ;;  %s308_s1 = inlined_call_operand.vmem [shape: f32[32,128], index: 1, kind: input, shape index: {}]   ;;  %s309_s2 = inlined_call_operand.vmem [shape: f32[1,128], index: 2, kind: input, shape index: {}]   ;;  %s310_s3 = inlined_call_operand.vmem [shape: f32[128,32], index: 3, kind: input, shape index: {}]   ;;  %s311_s4 = inlined_call_operand.vmem [shape: f32[1,32], index: 4, kind: input, shape index: {}]   ;;  %s312_s5 = inlined_call_operand.hbm [shape: f32[16,32], index: 5, kind: output, shape index: {}]  }
   0x1   :  { %v26_v0 = vld [vmem:[%s308_s1 + $0x18] sm:$0xff]  ;;  %v25_v1 = vld [vmem:[%s308_s1 + $0x10] sm:$0xff]  ;;  %v24_v2 = vld [vmem:[%s308_s1 + $0x8] sm:$0xff] }
   0x2   :  { %50 = vmatpush.msra.mxu0 %v26_v0  ;;  %v94_v3 = vld [vmem:[%s310_s3 + $0x78] sm:$0xff]  ;;  %v93_v4 = vld [vmem:[%s310_s3 + $0x70] sm:$0xff]  ;;  %v23_v5 = vld [vmem:[%s308_s1] sm:$0xff] }
   0x3   :  { %99 = vmatpush.msra.mxu1 %v94_v3  ;;  %v92_v6 = vld [vmem:[%s310_s3 + $0x68] sm:$0xff]  ;;  %144 = vmatpush.msra.mxu2 %v94_v3 }
   0x4   :  { %51 = vmatpush.msra.mxu0 %v25_v1 }
   0x5   :  { %10 = vsyncpa [#allocation3], 0  ;;  %v21_v7 = vld [vmem:[%s307_s0] sm:$0xff]  ;;  %vm31_vm0 = vcmask 261120   ;;  %100 = vmatpush.msra.mxu1 %v93_v4  ;;  %145 = vmatpush.msra.mxu2 %v93_v4  ;;  %v22_v8 = vld [vmem:[%s307_s0 + $0x8] sm:$0xff]  ;;  %s195_s11 = smov [#allocation2]  }
   0x6   :  { %52 = vmatpush.msra.mxu0 %v24_v2  ;;  %v91_v9 = vld [vmem:[%s310_s3 + $0x60] sm:$0xff]  ;;  %v90_v10 = vld [vmem:[%s310_s3 + $0x58] sm:$0xff]  ;;  %v89_v11 = vld [vmem:[%s310_s3 + $0x50] sm:$0xff]  ;;  %s128_s12 = sshll.u32 %s195_s11, 4  ;;  %s130_s15 = sshll.u32 %s312_s5, 4  ;;  %s129_s12 = int_to_ptr.vmem [resolvable:$true] %s128_s12  ;;  %s131_s15 = int_to_ptr.hbm [resolvable:$true] %s130_s15 }
   0x7   :  { %101 = vmatpush.msra.mxu1 %v92_v6  ;;  %146 = vmatpush.msra.mxu2 %v92_v6  ;;  %v88_v12 = vld [vmem:[%s310_s3 + $0x48] sm:$0xff]  ;;  %v87_v13 = vld [vmem:[%s310_s3 + $0x40] sm:$0xff]  ;;  %v86_v14 = vld [vmem:[%s310_s3 + $0x38] sm:$0xff]  ;;  %s196_s0 = smov 128   ;;  %s197_s16 = smov 8  }
   0x8   :  { %53 = vmatpush.msra.mxu0 %v23_v5  ;;  %v85_v15 = vld [vmem:[%s310_s3 + $0x30] sm:$0xff]  ;;  %v84_v16 = vld [vmem:[%s310_s3 + $0x28] sm:$0xff]  ;;  %v83_v17 = vld [vmem:[%s310_s3 + $0x20] sm:$0xff] }
   0x9   :  { %142 = vmatmul.msk.f32.vlgmr.msra.gmra.mxu0 %vm31_vm0, %v21_v7  ;;  %102 = vmatpush.msra.mxu1 %v91_v9  ;;  %v82_v18 = vld [vmem:[%s310_s3 + $0x18] sm:$0xff]  ;;  %v81_v19 = vld [vmem:[%s310_s3 + $0x10] sm:$0xff]  ;;  %v80_v20 = vld [vmem:[%s310_s3 + $0x8] sm:$0xff] }
   0xa   :  { %147 = vmatpush.msra.mxu2 %v91_v9  ;;  %v79_v21 = vld [vmem:[%s310_s3] sm:$0xff] }
   0xb   :  { %103 = vmatpush.msra.mxu1 %v90_v10  ;;  %v163_v22 = vld [vmem:[%s309_s2] ss:$0 sm:$0xff] }
   0xc   :  { %148 = vmatpush.msra.mxu2 %v90_v10  ;;  %v164_v45 = vld [vmem:[%s311_s4] ss:$0 sm:$0xff] }
   0xd   :  { %104 = vmatpush.msra.mxu1 %v89_v11 }
   0xe   :  { %149 = vmatpush.msra.mxu2 %v89_v11 }
   0xf   :  { %105 = vmatpush.msra.mxu1 %v88_v12 }
  0x10   :  { %150 = vmatpush.msra.mxu2 %v88_v12 }
  0x11   :  { %143 = vmatmul.msk.f32.gmra.mxu0 %vm31_vm0, %v22_v8  ;;  %106 = vmatpush.msra.mxu1 %v87_v13 }
  0x12   :  { %151 = vmatpush.msra.mxu2 %v87_v13 }
  0x13   :  { %107 = vmatpush.msra.mxu1 %v86_v14 }
  0x14   :  { %152 = vmatpush.msra.mxu2 %v86_v14 }
  0x15   :  { %108 = vmatpush.msra.mxu1 %v85_v15 }
  0x16   :  { %153 = vmatpush.msra.mxu2 %v85_v15 }
  0x17   :  { %109 = vmatpush.msra.mxu1 %v84_v16 }
  0x18   :  { %154 = vmatpush.msra.mxu2 %v84_v16 }
  0x19   :  { %110 = vmatpush.msra.mxu1 %v83_v17 }
  0x1a   :  { %155 = vmatpush.msra.mxu2 %v83_v17 }
  0x1b   :  { %111 = vmatpush.msra.mxu1 %v82_v18 }
  0x1c   :  { %156 = vmatpush.msra.mxu2 %v82_v18 }
  0x1d   :  { %112 = vmatpush.msra.mxu1 %v81_v19 }
  0x1e   :  { %157 = vmatpush.msra.mxu2 %v81_v19 }
  0x1f   :  { %113 = vmatpush.msra.mxu1 %v80_v20 }
  0x20   :  { %158 = vmatpush.msra.mxu2 %v80_v20 }
  0x21   :  { %114 = vmatpush.msra.mxu1 %v79_v21 }
  0x22   :  { %159 = vmatpush.msra.mxu2 %v79_v21 }
  0x86   :  { %v55_v23 = vpop.f32.mrf.mxu0 }
  0x87   :  { %v56_v24 = vadd.f32 %v163_v22, %v55_v23 }
  0x89   :  { %v61_v25 = vmul.f32 %v56_v24, %v56_v24 }
  0x8b   :  { %v63_v26 = vmul.f32 %v61_v25, %v56_v24 }
  0x8d   :  { %v65_v27 = vmul.f32 0.044715, %v63_v26 }
  0x8e   :  { %v58_v28 = vpop.f32.mrf.mxu0 }
  0x8f   :  { %v59_v29 = vadd.f32 %v163_v22, %v58_v28  ;;  %v67_v30 = vadd.f32 %v65_v27, %v56_v24 }
  0x91   :  { %v62_v31 = vmul.f32 %v59_v29, %v59_v29  ;;  %v69_v32 = vmul.f32 0.7978846, %v67_v30 }
  0x93   :  { %v64_v33 = vmul.f32 %v62_v31, %v59_v29  ;;  %165 = vtanh.f32 %v69_v32 }
  0x95   :  { %v66_v34 = vmul.f32 0.044715, %v64_v33 }
  0x97   :  { %v68_v35 = vadd.f32 %v66_v34, %v59_v29 }
  0x99   :  { %v166_v36 = vpop.eup %165  ;;  %v70_v37 = vmul.f32 0.7978846, %v68_v35 }
  0x9a   :  { %v73_v38 = vadd.f32 1.0, %v166_v36 }
  0x9b   :  { %167 = vtanh.f32 %v70_v37 }
  0x9c   :  { %v75_v39 = vmul.f32 0.5, %v73_v38 }
  0x9e   :  { %v77_v40 = vmul.f32 %v75_v39, %v56_v24 }
  0xa0   :  { %115 = vmatmul.f32.vlgmr.msra.gmra.mxu1 %v77_v40 }
  0xa1   :  { %v168_v41 = vpop.eup %167 }
  0xa2   :  { %v74_v42 = vadd.f32 1.0, %v168_v41 }
  0xa4   :  { %v76_v43 = vmul.f32 0.5, %v74_v42 }
  0xa6   :  { %v78_v44 = vmul.f32 %v76_v43, %v59_v29 }
  0xa8   :  { %118 = vmatmul.f32.vlgmr.msra.gmra.mxu2 %v78_v44 }
 0x11d   :  { %v116_v46 = vpop.f32.mrf.mxu1 }
 0x11e   :  { %v117_v47 = vadd.f32 %v164_v45, %v116_v46 }
 0x120   :  { %122 = vst.msk [vmem:[#allocation2] sm:$0xff] %vm31_vm0, %v117_v47 }
 0x12b   :  { %v119_v48 = vpop.f32.mrf.mxu2 }
 0x12c   :  { %v120_v49 = vadd.f32 %v164_v45, %v119_v48 }
 0x12e   :  { %123 = vst.msk [vmem:[#allocation2 + $0x8] sm:$0xff] %vm31_vm0, %v120_v49 }
 0x12f   :  { %136 = dma.vmem_to_hbm [thread:$0]  %s129_s12, 256, %s131_s15, [#allocation3], %s196_s0, %s196_s0, %s197_s16  }
 0x130   :  { %193 = dma.done.wait [#allocation3], 256  }
 0x131   :  { %194 = vsyncadd [#allocation3], 4294967040 }
 0x132   :  { %141 = vsyncpa [#allocation3], 1 }

</bundles_post_ra>
